<compile_context>
chip_gen: v7x
topology: tpu7x:2x2x1
jax: 0.10.0
libtpu: 0.0.40
codegen_flags: <defaults>
</compile_context>

<pallas_src>
import functools

import jax
import jax.numpy as jnp
from jax import lax
from jax.experimental import pallas as pl
from jax.experimental.pallas import tpu as pltpu


def _round_up(x, m):
    return (x + m - 1) // m * m


def _transition_kernel(x_ref, m_ref, g_ref, b_ref, w1_ref, w2_ref, o_ref,
                       *, dim_inner, use_layer_norm, eps):
    """One row-tile: (LayerNorm?) -> W1 -> SwiGLU -> W2 -> mask."""
    x = x_ref[...].astype(jnp.float32)                          # [TILE, dim] f32

    if use_layer_norm:
        # Single-pass stats: var = E[x^2] - mu^2 (one fewer XLU reduction pass).
        mu = jnp.mean(x, axis=-1, keepdims=True)
        ms = jnp.mean(x * x, axis=-1, keepdims=True)
        var = ms - mu * mu
        x = (x - mu) * lax.rsqrt(var + eps)
        x = x * g_ref[...] + b_ref[...]                         # gamma/beta: [1, dim] f32

    # bf16 operands, f32 accumulation -> native MXU throughput.
    xb = x.astype(jnp.bfloat16)
    h = jnp.dot(xb, w1_ref[...], preferred_element_type=jnp.float32)  # [TILE, 2*di] f32
    a = h[:, :dim_inner]                                        # "x" half of chunk
    gates = h[:, dim_inner:]                                    # "gates" half of chunk
    hidden = (gates * jax.nn.sigmoid(gates)) * a                # silu(gates) * x  (EUP)

    out = jnp.dot(hidden.astype(jnp.bfloat16), w2_ref[...],
                  preferred_element_type=jnp.float32)           # [TILE, dim] f32

    o_ref[...] = (out * m_ref[...]).astype(o_ref.dtype)         # mask broadcast over dim


def transition_forward(x, mask, params, *, layer_norm=False, tile_rows=256, eps=1e-5):
    """x: [b, n, dim]; mask: [b, n] (0/1). Returns [b, n, dim] in x.dtype."""
    b, n, dim = x.shape
    # Weights go to bf16 once in the wrapper (halves resident VMEM, native MXU path).
    w1_t = params["w1_t"].astype(jnp.bfloat16)      # [dim, 2*dim_inner]
    w2_t = params["w2_t"].astype(jnp.bfloat16)      # [dim_inner, dim]
    gamma = params["gamma"].astype(jnp.float32).reshape(1, dim)
    beta = params["beta"].astype(jnp.float32).reshape(1, dim)
    dim_inner = w2_t.shape[0]

    rows = b * n
    # Large row tile, but never larger than (rows rounded up to a sublane multiple).
    tile_rows = max(8, min(tile_rows, _round_up(rows, 8)))
    rows_padded = _round_up(rows, tile_rows)

    x2 = x.reshape(rows, dim)
    m2 = mask.astype(jnp.float32).reshape(rows, 1)
    if rows_padded != rows:
        pad = rows_padded - rows
        x2 = jnp.pad(x2, ((0, pad), (0, 0)))      # padded rows are masked out (mask=0)
        m2 = jnp.pad(m2, ((0, pad), (0, 0)))

    # VMEM footprint estimate (double-buffered I/O tiles + resident weights + f32 temps).
    x_itemsize = jnp.dtype(x.dtype).itemsize
    weight_bytes = (dim * 2 * dim_inner + dim_inner * dim) * 2 * 2   # bf16, 2 buffers each
    io_bytes = 2 * tile_rows * dim * x_itemsize * 2 + 2 * tile_rows * 4 * 2
    inter_bytes = (tile_rows * 2 * dim_inner * 4        # h (f32)
                   + tile_rows * dim_inner * 4          # hidden (f32)
                   + tile_rows * 2 * dim_inner * 2)     # bf16 operand copies
    vmem_est = weight_bytes + io_bytes + inter_bytes + 4 * dim * 4
    # Cap at 64 MiB so the limit is valid on v7x (64 MiB VMEM/TC) as well as v5e/v6e.
    vmem_limit = int(min(max(2 * vmem_est, 32 * 1024 * 1024), 64 * 1024 * 1024))

    cost = pl.CostEstimate(
        flops=6 * rows_padded * dim * dim_inner,
        transcendentals=rows_padded * dim_inner,
        bytes_accessed=(2 * rows_padded * dim * x_itemsize
                        + rows_padded * 4
                        + (dim * 2 * dim_inner + dim_inner * dim) * 2
                        + 2 * dim * 4),
    )

    kernel = functools.partial(
        _transition_kernel,
        dim_inner=dim_inner,
        use_layer_norm=layer_norm,
        eps=eps,
    )

    out2 = pl.pallas_call(
        kernel,
        out_shape=jax.ShapeDtypeStruct((rows_padded, dim), x.dtype),
        grid_spec=pltpu.PrefetchScalarGridSpec(
            num_scalar_prefetch=0,
            grid=(rows_padded // tile_rows,),
            in_specs=[
                pl.BlockSpec((tile_rows, dim), lambda i: (i, 0)),            # x rows
                pl.BlockSpec((tile_rows, 1), lambda i: (i, 0)),              # mask rows
                pl.BlockSpec((1, dim), lambda i: (0, 0)),                    # gamma (resident)
                pl.BlockSpec((1, dim), lambda i: (0, 0)),                    # beta  (resident)
                pl.BlockSpec((dim, 2 * dim_inner), lambda i: (0, 0)),        # W1^T  (resident)
                pl.BlockSpec((dim_inner, dim), lambda i: (0, 0)),            # W2^T  (resident)
            ],
            out_specs=pl.BlockSpec((tile_rows, dim), lambda i: (i, 0)),
        ),
        compiler_params=pltpu.CompilerParams(
            dimension_semantics=("parallel",),
            vmem_limit_bytes=vmem_limit,
        ),
        cost_estimate=cost,
    )(x2, m2, gamma, beta, w1_t, w2_t)

    # TODO(synk): for production dims < 128 (lane-sparse output stores), pad `dim` to 128
    # in the wrapper (with LN stats corrected for the real dim); AF3 dims 384/768 are fine.
    return out2[:rows].reshape(b, n, dim)


def reference_forward(x, mask, params, *, layer_norm=False, eps=1e-5):
    """Pure-JAX f32 reference matching the PyTorch module semantics."""
    h = x
    if layer_norm:
        mu = jnp.mean(h, axis=-1, keepdims=True)
        var = jnp.mean((h - mu) ** 2, axis=-1, keepdims=True)
        h = (h - mu) * lax.rsqrt(var + eps)
        h = h * params["gamma"] + params["beta"]
    h = h @ params["w1_t"]
    dim_inner = params["w2_t"].shape[0]
    a, gates = h[..., :dim_inner], h[..., dim_inner:]
    h = jax.nn.silu(gates) * a
    h = h @ params["w2_t"]
    return h * mask[..., None].astype(x.dtype)


def init_params(key, dim, expansion_factor=4):
    dim_inner = int(dim * expansion_factor)
    k1, k2, k3, k4 = jax.random.split(key, 4)
    # PyTorch Linear weights are [out, in]; store transposed ([in, out]) for the kernel.
    w1 = jax.random.normal(k1, (dim_inner * 2, dim), jnp.float32) * 0.05
    w2 = jax.random.normal(k2, (dim, dim_inner), jnp.float32) * 0.05
    gamma = 1.0 + 0.1 * jax.random.normal(k3, (dim,), jnp.float32)
    beta = 0.1 * jax.random.normal(k4, (dim,), jnp.float32)
    return {"w1_t": w1.T, "w2_t": w2.T, "gamma": gamma, "beta": beta}


if __name__ == "__main__":
    key = jax.random.PRNGKey(0)
    kx, km, kp = jax.random.split(key, 3)

    b, n, dim = 2, 8, 32
    x = jax.random.normal(kx, (b, n, dim), jnp.float32)
    mask = (jax.random.uniform(km, (b, n)) > 0.3).astype(jnp.float32)
    params = init_params(kp, dim, expansion_factor=4)

    for use_ln in (False, True):  # default module config is layer_norm=False
        out = transition_forward(x, mask, params, layer_norm=use_ln)
        out = jax.block_until_ready(out)
        ref = reference_forward(x, mask, params, layer_norm=use_ln)
        assert out.shape == (b, n, dim)
        err = float(jnp.max(jnp.abs(out - ref)))
        # bf16 matmul operands (f32 accumulation) -> loosened tolerance vs f32 reference.
        assert jnp.allclose(out, ref, atol=5e-3, rtol=5e-2), (
            f"mismatch (layer_norm={use_ln}): {err}")

    print("KERNEL_OK")
</pallas_src>

<mosaic_0001>
module attributes {stable_mosaic.version = 11 : i64} {
  func.func @_transition_kernel(%arg0: i32, %arg1: memref<16x32xf32, #tpu.memory_space<vmem>>, %arg2: memref<16x1xf32, #tpu.memory_space<vmem>>, %arg3: memref<1x32xf32, #tpu.memory_space<vmem>>, %arg4: memref<1x32xf32, #tpu.memory_space<vmem>>, %arg5: memref<32x256xbf16, #tpu.memory_space<vmem>>, %arg6: memref<128x32xbf16, #tpu.memory_space<vmem>>, %arg7: memref<16x32xf32, #tpu.memory_space<vmem>>) attributes {dimension_semantics = [#tpu.dimension_semantics<parallel>], iteration_bounds = array<i64: 1>, scalar_prefetch = 0 : i64, scratch_operands = 0 : i64, tpu.core_type = #tpu.core_type<tc>, window_params = [{transform_indices = @transform_0, window_bounds = array<i64: 16, 32>}, {transform_indices = @transform_1, window_bounds = array<i64: 16, 1>}, {pipeline_mode = #tpu.pipeline_mode<synchronous>, transform_indices = @transform_2, window_bounds = array<i64: 1, 32>}, {pipeline_mode = #tpu.pipeline_mode<synchronous>, transform_indices = @transform_3, window_bounds = array<i64: 1, 32>}, {pipeline_mode = #tpu.pipeline_mode<synchronous>, transform_indices = @transform_4, window_bounds = array<i64: 32, 256>}, {pipeline_mode = #tpu.pipeline_mode<synchronous>, transform_indices = @transform_5, window_bounds = array<i64: 128, 32>}, {transform_indices = @transform_6, window_bounds = array<i64: 16, 32>}]} {
    %c0 = arith.constant 0 : index
    %c0_0 = arith.constant 0 : index
    %0 = vector.load %arg1[%c0, %c0_0] : memref<16x32xf32, #tpu.memory_space<vmem>>, vector<16x32xf32>
    %1 = arith.truncf %0 : vector<16x32xf32> to vector<16x32xbf16>
    %c0_1 = arith.constant 0 : index
    %c0_2 = arith.constant 0 : index
    %2 = vector.load %arg5[%c0_1, %c0_2] : memref<32x256xbf16, #tpu.memory_space<vmem>>, vector<32x256xbf16>
    %cst = arith.constant dense<0.000000e+00> : vector<16x256xf32>
    %3 = tpu.matmul %1, %2, %cst {dimension_numbers = #tpu.dot_dimension_numbers<[1], [0], [0], [1], [0, 0, 1, 1], [], []>} : vector<16x32xbf16>, vector<32x256xbf16>, vector<16x256xf32> -> vector<16x256xf32>
    %4 = vector.extract_strided_slice %3 {offsets = [0, 0], sizes = [16, 128], strides = [1, 1]} : vector<16x256xf32> to vector<16x128xf32>
    %5 = vector.extract_strided_slice %3 {offsets = [0, 128], sizes = [16, 128], strides = [1, 1]} : vector<16x256xf32> to vector<16x128xf32>
    %6 = arith.negf %5 : vector<16x128xf32>
    %7 = math.exp %6 : vector<16x128xf32>
    %cst_3 = arith.constant 1.000000e+00 : f32
    %8 = vector.broadcast %cst_3 : f32 to vector<16x128xf32>
    %9 = arith.addf %8, %7 : vector<16x128xf32>
    %10 = arith.divf %8, %9 : vector<16x128xf32>
    %11 = arith.mulf %5, %10 : vector<16x128xf32>
    %12 = arith.mulf %11, %4 : vector<16x128xf32>
    %13 = arith.truncf %12 : vector<16x128xf32> to vector<16x128xbf16>
    %c0_4 = arith.constant 0 : index
    %c0_5 = arith.constant 0 : index
    %14 = vector.load %arg6[%c0_4, %c0_5] : memref<128x32xbf16, #tpu.memory_space<vmem>>, vector<128x32xbf16>
    %cst_6 = arith.constant dense<0.000000e+00> : vector<16x32xf32>
    %15 = tpu.matmul %13, %14, %cst_6 {dimension_numbers = #tpu.dot_dimension_numbers<[1], [0], [0], [1], [0, 0, 1, 1], [], []>} : vector<16x128xbf16>, vector<128x32xbf16>, vector<16x32xf32> -> vector<16x32xf32>
    %c0_7 = arith.constant 0 : index
    %c0_8 = arith.constant 0 : index
    %16 = vector.load %arg2[%c0_7, %c0_8] : memref<16x1xf32, #tpu.memory_space<vmem>>, vector<16x1xf32>
    %17 = vector.broadcast %16 : vector<16x1xf32> to vector<16x32xf32>
    %18 = arith.mulf %15, %17 : vector<16x32xf32>
    %c0_9 = arith.constant 0 : index
    %c0_10 = arith.constant 0 : index
    %19 = vector.load %arg7[%c0_9, %c0_10] : memref<16x32xf32, #tpu.memory_space<vmem>>, vector<16x32xf32>
    tpu.vector_store %arg7[%c0_9, %c0_10], %18 {strides = array<i32>} : memref<16x32xf32, #tpu.memory_space<vmem>>, vector<16x32xf32>,
    return
  }
  func.func @transform_0(%arg0: i32) -> (i32, i32) {
    %c0_i32 = arith.constant 0 : i32
    %c0_i32_0 = arith.constant 0 : i32
    return %arg0, %c0_i32 : i32, i32
  }
  func.func @transform_1(%arg0: i32) -> (i32, i32) {
    %c0_i32 = arith.constant 0 : i32
    %c0_i32_0 = arith.constant 0 : i32
    return %arg0, %c0_i32 : i32, i32
  }
  func.func @transform_2(%arg0: i32) -> (i32, i32) {
    %c0_i32 = arith.constant 0 : i32
    %c0_i32_0 = arith.constant 0 : i32
    %c0_i32_1 = arith.constant 0 : i32
    return %c0_i32, %c0_i32_0 : i32, i32
  }
  func.func @transform_3(%arg0: i32) -> (i32, i32) {
    %c0_i32 = arith.constant 0 : i32
    %c0_i32_0 = arith.constant 0 : i32
    %c0_i32_1 = arith.constant 0 : i32
    return %c0_i32, %c0_i32_0 : i32, i32
  }
  func.func @transform_4(%arg0: i32) -> (i32, i32) {
    %c0_i32 = arith.constant 0 : i32
    %c0_i32_0 = arith.constant 0 : i32
    %c0_i32_1 = arith.constant 0 : i32
    return %c0_i32, %c0_i32_0 : i32, i32
  }
  func.func @transform_5(%arg0: i32) -> (i32, i32) {
    %c0_i32 = arith.constant 0 : i32
    %c0_i32_0 = arith.constant 0 : i32
    %c0_i32_1 = arith.constant 0 : i32
    return %c0_i32, %c0_i32_0 : i32, i32
  }
  func.func @transform_6(%arg0: i32) -> (i32, i32) {
    %c0_i32 = arith.constant 0 : i32
    %c0_i32_0 = arith.constant 0 : i32
    return %arg0, %c0_i32 : i32, i32
  }
}

</mosaic_0001>

<bundles_post_ra>
// kernel: tpu_custom_call.1
= control target key start
LH: loop header
LB: loop body
LE: loop exit
PB: predicated region body
PF: predicated region fallthrough
CT: control target
= control target key end

     0   :  { %v350_v2 = vmov 0   ;;  %vm52_vm0 = vcmask 261120   ;;  %s454_s0 = inlined_call_operand.vmem [shape: f32[16,32], index: 0, kind: input, shape index: {}]   ;;  %s455_s1 = inlined_call_operand.vmem [shape: f32[16,1], index: 1, kind: input, shape index: {}]   ;;  %s456_s2 = inlined_call_operand.vmem [shape: f32[1,32], index: 2, kind: input, shape index: {}]   ;;  %s457_s3 = inlined_call_operand.vmem [shape: f32[1,32], index: 3, kind: input, shape index: {}]   ;;  %s458_s4 = inlined_call_operand.vmem [shape: bf16[32,256], index: 4, kind: input, shape index: {}]   ;;  %s459_s5 = inlined_call_operand.vmem [shape: bf16[128,32], index: 5, kind: input, shape index: {}]   ;;  %s460_s6 = inlined_call_operand.hbm [shape: f32[16,32], index: 6, kind: output, shape index: {}]  }
   0x1   :  { %v304_v0 = vld [vmem:[%s458_s4 + $0x4] ss:$8 sps:$4 sm:$0xff]   ;;  %v306_v1 = vld [vmem:[%s458_s4] ss:$8 sps:$4 sm:$0xff]   ;;  %88 = vmatprep.mubr.bf16.mxu0 %v350_v2  ;;  %303 = vset.pattern.permute.xlu0 %v350_v2  ;;  %v307_v3 = vld [vmem:[%s458_s4 + $0x14] ss:$8 sps:$4 sm:$0xff]  }
   0x2   :  { %56 = vmatprep.subr.bf16.mxu0 %v304_v0  ;;  %v309_v4 = vld [vmem:[%s458_s4 + $0x10] ss:$8 sps:$4 sm:$0xff]   ;;  %v25_v5 = vld [vmem:[%s454_s0] sm:$0xff]  ;;  %v26_v6 = vld [vmem:[%s454_s0 + $0x8] sm:$0xff] }
   0x3   :  { %57 = vmatpush1.bf16.msra.mxu0 %v306_v1  ;;  %v27_v7 = vpack.c.bf16 %v26_v6, %v25_v5 }
   0x4   :  { %58 = vmatprep.subr.bf16.mxu0 %v307_v3 }
   0x7   :  { %59 = vmatpush1.bf16.msra.mxu0 %v309_v4 }
   0x8   :  { %11 = vsyncpa [#allocation3], 0  ;;  %v310_v8 = vld [vmem:[%s459_s5] sm:$0xff]   ;;  %v351_v9 = vmov 0.0   ;;  %v311_v10 = vld [vmem:[%s459_s5 + $0x8] sm:$0xff]   ;;  %vm352_vm1 = vmmov 0  }
   0x9   :  { %277 = vmatprep.subr.bf16.mxu1 %v351_v9  ;;  %v312_v11 = vld [vmem:[%s459_s5 + $0x10] sm:$0xff]   ;;  %v313_v12 = vld [vmem:[%s459_s5 + $0x18] sm:$0xff]   ;;  %v314_v13 = vld [vmem:[%s459_s5 + $0x20] sm:$0xff]   ;;  %293 = vmatprep.mubr.msk.bf16.mxu1 %vm352_vm1, %v351_v9 }
   0xa   :  { %257 = vmatmul.mubr.msk.bf16.vlgmr.msra.gmra.mrb[0].mxu0 %vm52_vm0, %v27_v7  ;;  %278 = vmatpush3.bf16.msra.mxu1 %v310_v8  ;;  %v315_v14 = vld [vmem:[%s459_s5 + $0x28] sm:$0xff]   ;;  %v316_v15 = vld [vmem:[%s459_s5 + $0x30] sm:$0xff]   ;;  %v317_v16 = vld [vmem:[%s459_s5 + $0x38] sm:$0xff]  }
   0xb   :  { %279 = vmatprep.subr.bf16.mxu1 %v351_v9  ;;  %v221_v17 = vld [vmem:[%s455_s1] sm:$0xff]  ;;  %v222_v18 = vld [vmem:[%s455_s1 + $0x8] sm:$0xff]  ;;  %s353_s1 = smov [#allocation2]  }
   0xc   :  { %225 = vperm.xlu0 %303, %v221_v17   ;;  %s242_s5 = sshll.u32 %s353_s1, 4  ;;  %s243_s5 = int_to_ptr.vmem [resolvable:$true] %s242_s5 }
   0xd   :  { %s326_s2 = scalar_lea.vmem %s243_s5, 256  ;;  %p331_p1 = scmp.lt.s32.totalorder %s243_s5, %s243_s5 }
   0xe   :  { %280 = vmatpush3.bf16.msra.mxu1 %v311_v10  ;;  %p327_p0 = scmp.ne.s32.totalorder %s243_s5, %s326_s2  ;;  %p332_p2 = scmp.lt.s32.totalorder %s326_s2, %s326_s2 }
   0xf   :  { %281 = vmatprep.subr.bf16.mxu1 %v351_v9 }
  0x10   :  { %230 = vperm.xlu0 %303, %v222_v18   ;;  %p333_p3 = por %p332_p2, %p331_p1 }
  0x12   :  { %282 = vmatpush3.bf16.msra.mxu1 %v312_v11  ;;  %p334_p4 = pnand %p333_p3, %p327_p0 }
  0x13   :  { %283 = vmatprep.subr.bf16.mxu1 %v351_v9 }
  0x16   :  { %284 = vmatpush3.bf16.msra.mxu1 %v313_v12 }
  0x17   :  { %285 = vmatprep.subr.bf16.mxu1 %v351_v9 }
  0x1a   :  { %286 = vmatpush3.bf16.msra.mxu1 %v314_v13 }
  0x1b   :  { %287 = vmatprep.subr.bf16.mxu1 %v351_v9 }
  0x1e   :  { %288 = vmatpush3.bf16.msra.mxu1 %v315_v14 }
  0x1f   :  { %289 = vmatprep.subr.bf16.mxu1 %v351_v9 }
  0x22   :  { %290 = vmatpush3.bf16.msra.mxu1 %v316_v15 }
  0x23   :  { %291 = vmatprep.subr.bf16.mxu1 %v351_v9 }
  0x26   :  { %292 = vmatpush3.bf16.msra.mxu1 %v317_v16 }
  0x8b   :  { %v226_v36 = vpop.permute.xlu0 %225 }
  0x8f   :  { %v231_v40 = vpop.permute.xlu0 %230 }
  0xdd   :  { %v90_v19 = vpop.f32.mrb[0].mxu0 }
  0xde   :  { %v92_v20 = vpop.f32.mrb[1].mxu0 }
  0xdf   :  { %v258_v21 = vmul.f32 -1.442695, %v92_v20  ;;  %v94_v22 = vpop.f32.mrb[2].mxu0 }
  0xe0   :  { %v96_v23 = vpop.f32.mrb[3].mxu0 }
  0xe1   :  { %318 = vpow2.f32 %v258_v21  ;;  %v259_v24 = vmul.f32 -1.442695, %v96_v23 }
  0xe3   :  { %320 = vpow2.f32 %v259_v24 }
  0xeb   :  { %v319_v25 = vpop.eup %318 }
  0xec   :  { %v105_v26 = vadd.f32 1.0, %v319_v25 }
  0xed   :  { %v321_v27 = vpop.eup %320 }
  0xee   :  { %322 = vrcp.f32 %v105_v26  ;;  %v106_v28 = vadd.f32 1.0, %v321_v27 }
  0xf0   :  { %324 = vrcp.f32 %v106_v28 }
  0xf8   :  { %v323_v29 = vpop.eup %322 }
  0xf9   :  { %v111_v30 = vmul.f32 %v323_v29, %v92_v20 }
  0xfa   :  { %v325_v31 = vpop.eup %324 }
  0xfb   :  { %v113_v32 = vmul.f32 %v111_v30, %v90_v19  ;;  %v112_v33 = vmul.f32 %v325_v31, %v96_v23 }
  0xfd   :  { %v114_v34 = vmul.f32 %v112_v33, %v94_v22 }
  0xff   :  { %v115_v35 = vpack.c.bf16 %v114_v34, %v113_v32 }
 0x101   :  { %294 = vmatmul.mubr.bf16.vlgmr.msra.gmra.mrb[0].mxu1 %v115_v35 }
 0x1d4   :  { %v214_v37 = vpop.f32.mrb[0].mxu1 }
 0x1d5   :  { %v233_v38 = vmul.f32 %v226_v36, %v214_v37  ;;  %v295_v39 = vpop.f32.mrb[1].mxu1 }
 0x1d6   :  { %v217_v41 = vpop.f32.mrb[2].mxu1 }
 0x1d7   :  { %235 = vst.msk [vmem:[#allocation2] sm:$0xff] %vm52_vm0, %v233_v38  ;;  %v234_v42 = vmul.f32 %v231_v40, %v217_v41  ;;  %v296_v43 = vpop.f32.mrb[3].mxu1 }
 0x1d9   :  { %236 = vst.msk [vmem:[#allocation2 + $0x8] sm:$0xff] %vm52_vm0, %v234_v42 }
 0x1da   :  { %337 = shalt.err (!%p334_p4)
}
 0x1db   :  { %s338_s26 = scalar_lea.hbm %s460_s6, 256 }
 0x1dc   :  { %p339_p5 = scmp.ne.s32.totalorder %s460_s6, %s338_s26  ;;  %p342_p6 = scmp.lt.u32.totalorder %s338_s26, %s460_s6 }
 0x1de   :  { %p344_p7 = pnand %p342_p6, %p339_p5 }
 0x1e0   :  { %347 = shalt.err (!%p344_p7)
}
 0x1e1   :  { %s354_s7 = smov 128   ;;  %s355_s8 = smov 8  }
 0x1e2   :  { %248 = dma.vmem_to_hbm [thread:$0]  %s243_s5, 256, %s460_s6, [#allocation3], %s354_s7, %s354_s7, %s355_s8  }
 0x1e3   :  { %348 = dma.done.wait [#allocation3], 256  }
 0x1e4   :  { %349 = vsyncadd [#allocation3], 4294967040 }
 0x1e5   :  { %252 = vsyncpa [#allocation3], 1 }

</bundles_post_ra>
